<compile_context>
chip_gen: v7x
topology: tpu7x:2x2x1
jax: 0.10.0
libtpu: 0.0.40
codegen_flags: <defaults>
</compile_context>

<pallas_src>
import functools

import jax
import jax.numpy as jnp
from jax.experimental import pallas as pl
from jax.experimental.pallas import tpu as pltpu

EPS = 1e-5
LEAKY_SLOPE = 0.2
MM_PREC = jax.lax.Precision.HIGHEST  # keep full f32 accuracy on the MXU


def _resnet_block_kernel(x_ref, w1_ref, w2_ref, mask_ref, o_ref, stacked_ref,
                         *, H, W):
    """x_ref/o_ref: (Nb, Cp, HW) VMEM; w*_ref: (Cp, 9*Cp); mask_ref: (9, HW);
    stacked_ref: (9*Cp, HW) VMEM scratch holding the tap-stacked conv input."""
    Nb, Cp, HW = x_ref.shape

    w1 = w1_ref[...]
    w2 = w2_ref[...]
    masks = mask_ref[...]                      # (9, HW) f32, precomputed constant

    # Static per-tap lane shifts for the zero-padded 'same' 3x3 conv
    # (tap order t = ky*3 + kx, matching the folded weight layout).
    shifts = [(-((ky - 1) * W + (kx - 1))) % HW
              for ky in range(3) for kx in range(3)]

    inv_hw = 1.0 / HW

    def leaky(v):
        return jnp.where(v >= 0, v, LEAKY_SLOPE * v)

    def inorm(v):
        # Single reduction pass: sum & sum-of-squares, var = E[x^2] - mean^2.
        s = jnp.sum(v, axis=1, keepdims=True)
        sq = jnp.sum(v * v, axis=1, keepdims=True)
        mean = s * inv_hw
        var = jnp.maximum(sq * inv_hw - mean * mean, 0.0)
        return (v - mean) * jax.lax.rsqrt(var + EPS)

    def conv3x3(v, w):
        # All 9 taps folded into one MXU matmul with contraction depth 9*Cp.
        # (For large C, split into 3 per-ky-row dots to limit input duplication.)
        for t, s in enumerate(shifts):
            if s == 0:                               # center tap: no roll, no mask
                tap = v
            else:
                tap = pltpu.roll(v, s, axis=1) * masks[t:t + 1, :]
            stacked_ref[pl.ds(t * Cp, Cp), :] = tap  # aligned sublane store (Cp % 8 == 0)
        return jnp.dot(w, stacked_ref[...],
                       preferred_element_type=jnp.float32, precision=MM_PREC)

    for n in range(Nb):                              # unrolled, Nb images per step
        x = x_ref[n].astype(jnp.float32)             # (Cp, HW) lane-dense
        y = leaky(inorm(conv3x3(x, w1)))             # conv1 -> IN -> LeakyReLU
        y = inorm(conv3x3(y, w2))                    # conv2 -> IN
        o_ref[n] = leaky(x + y).astype(o_ref.dtype)  # skip + LeakyReLU (dense vst)


def _pick_block_n(n):
    """Largest divisor of n (<= 8) that still leaves >= 2 grid steps,
    so the batch axis can be split across both v7x TensorCores."""
    if n <= 1:
        return 1
    best = 1
    for nb in range(1, min(n // 2, 8) + 1):
        if n % nb == 0:
            best = nb
    return best


@jax.jit
def resnet_block(x, w1, w2):
    """x: (N, C, H, W) f32; w1, w2: (C, C, 3, 3) f32 (OIHW, bias-free)."""
    N, C, H, W = x.shape
    HW = H * W
    Cp = ((C + 7) // 8) * 8          # pad channels to the f32 sublane tile (8)
    Nb = _pick_block_n(N)

    x_flat = x.reshape(N, C, HW).astype(jnp.float32)
    if Cp > C:
        x_flat = jnp.pad(x_flat, ((0, 0), (0, Cp - C), (0, 0)))

    def fold_w(w):
        w = w.astype(jnp.float32)
        if Cp > C:
            w = jnp.pad(w, ((0, Cp - C), (0, Cp - C), (0, 0), (0, 0)))
        # OIHW -> (O, ky, kx, I) -> (O, 9*I): tap-major along the lane axis,
        # matching the sublane-stacked taps of the in-kernel contraction.
        return jnp.transpose(w, (0, 2, 3, 1)).reshape(Cp, 9 * Cp)

    w1_f = fold_w(w1)
    w2_f = fold_w(w2)

    # Boundary masks for the shifted taps (zero padding), hoisted out of the
    # kernel: they depend only on spatial position, not channel or batch.
    pos = jnp.arange(HW, dtype=jnp.int32)
    row = pos // W
    col = pos - row * W
    masks = []
    for ky in range(3):
        for kx in range(3):
            dy, dx = ky - 1, kx - 1
            valid = ((row + dy >= 0) & (row + dy <= H - 1) &
                     (col + dx >= 0) & (col + dx <= W - 1))
            masks.append(valid.astype(jnp.float32))
    mask_arr = jnp.stack(masks, axis=0)               # (9, HW)

    # Explicit VMEM budget: double-buffered in/out blocks + weights + masks +
    # tap-stacked scratch + live f32 intermediates; capped at v7x's 64 MiB.
    block_bytes = Nb * Cp * HW * 4
    vmem_est = (4 * block_bytes                 # in + out, double-buffered
                + 4 * Cp * 9 * Cp * 4           # w1 + w2, double-buffered
                + 2 * 9 * HW * 4                # masks
                + 9 * Cp * HW * 4               # tap-stacked scratch
                + 12 * Cp * HW * 4)             # live intermediates headroom
    vmem_limit = int(min(max(2 * vmem_est, 32 * 1024 * 1024), 64 * 1024 * 1024))

    cost = pl.CostEstimate(
        flops=N * (2 * 2 * Cp * 9 * Cp * HW + 24 * Cp * HW),
        transcendentals=2 * N * Cp,
        bytes_accessed=2 * N * Cp * HW * 4 + 2 * 9 * Cp * Cp * 4 + 9 * HW * 4,
    )

    out = pl.pallas_call(
        functools.partial(_resnet_block_kernel, H=H, W=W),
        out_shape=jax.ShapeDtypeStruct((N, Cp, HW), x.dtype),
        grid=(N // Nb,),
        in_specs=[
            pl.BlockSpec((Nb, Cp, HW), lambda b: (b, 0, 0)),
            pl.BlockSpec((Cp, 9 * Cp), lambda b: (0, 0)),
            pl.BlockSpec((Cp, 9 * Cp), lambda b: (0, 0)),
            pl.BlockSpec((9, HW), lambda b: (0, 0)),
        ],
        out_specs=pl.BlockSpec((Nb, Cp, HW), lambda b: (b, 0, 0)),
        scratch_shapes=[pltpu.VMEM((9 * Cp, HW), jnp.float32)],
        compiler_params=pltpu.CompilerParams(
            dimension_semantics=("parallel",),
            vmem_limit_bytes=vmem_limit),
        cost_estimate=cost,
    )(x_flat, w1_f, w2_f, mask_arr)

    return out[:, :C, :].reshape(N, C, H, W)


# ---------------- pure-JAX reference (verification only) --------------------
def _ref_forward(x, w1, w2):
    def conv(v, w):
        return jax.lax.conv_general_dilated(
            v, w, window_strides=(1, 1), padding=[(1, 1), (1, 1)],
            dimension_numbers=("NCHW", "OIHW", "NCHW"),
            precision=jax.lax.Precision.HIGHEST)

    def inorm(v):
        m = v.mean(axis=(2, 3), keepdims=True)
        var = ((v - m) ** 2).mean(axis=(2, 3), keepdims=True)
        return (v - m) / jnp.sqrt(var + EPS)

    def leaky(v):
        return jnp.where(v >= 0, v, LEAKY_SLOPE * v)

    y = leaky(inorm(conv(x, w1)))
    y = inorm(conv(y, w2))
    return leaky(x + y)


if __name__ == "__main__":
    key = jax.random.PRNGKey(0)
    kx, k1, k2 = jax.random.split(key, 3)

    N, C, H, W = 2, 4, 16, 16  # dim = 4
    x = jax.random.normal(kx, (N, C, H, W), dtype=jnp.float32)
    w1 = 0.1 * jax.random.normal(k1, (C, C, 3, 3), dtype=jnp.float32)
    w2 = 0.1 * jax.random.normal(k2, (C, C, 3, 3), dtype=jnp.float32)

    out = jax.block_until_ready(resnet_block(x, w1, w2))
    ref = _ref_forward(x, w1, w2)

    assert out.shape == (N, C, H, W)
    max_err = float(jnp.max(jnp.abs(out - ref)))
    assert jnp.allclose(out, ref, atol=2e-3, rtol=2e-3), max_err

    print("KERNEL_OK")
</pallas_src>

<mosaic_0001>
module attributes {stable_mosaic.version = 11 : i64} {
  func.func @_resnet_block_kernel(%arg0: i32, %arg1: memref<1x8x256xf32, #tpu.memory_space<vmem>>, %arg2: memref<8x72xf32, #tpu.memory_space<vmem>>, %arg3: memref<8x72xf32, #tpu.memory_space<vmem>>, %arg4: memref<9x256xf32, #tpu.memory_space<vmem>>, %arg5: memref<1x8x256xf32, #tpu.memory_space<vmem>>, %arg6: memref<72x256xf32, #tpu.memory_space<vmem>>) attributes {dimension_semantics = [#tpu.dimension_semantics<parallel>], iteration_bounds = array<i64: 2>, scalar_prefetch = 0 : i64, scratch_operands = 1 : i64, tpu.core_type = #tpu.core_type<tc>, window_params = [{transform_indices = @transform_0, window_bounds = array<i64: 1, 8, 256>}, {pipeline_mode = #tpu.pipeline_mode<synchronous>, transform_indices = @transform_1, window_bounds = array<i64: 8, 72>}, {pipeline_mode = #tpu.pipeline_mode<synchronous>, transform_indices = @transform_2, window_bounds = array<i64: 8, 72>}, {pipeline_mode = #tpu.pipeline_mode<synchronous>, transform_indices = @transform_3, window_bounds = array<i64: 9, 256>}, {transform_indices = @transform_4, window_bounds = array<i64: 1, 8, 256>}]} {
    %c0 = arith.constant 0 : index
    %c0_0 = arith.constant 0 : index
    %0 = vector.load %arg2[%c0, %c0_0] : memref<8x72xf32, #tpu.memory_space<vmem>>, vector<8x72xf32>
    %c0_1 = arith.constant 0 : index
    %c0_2 = arith.constant 0 : index
    %1 = vector.load %arg3[%c0_1, %c0_2] : memref<8x72xf32, #tpu.memory_space<vmem>>, vector<8x72xf32>
    %c0_3 = arith.constant 0 : index
    %c0_4 = arith.constant 0 : index
    %2 = vector.load %arg4[%c0_3, %c0_4] : memref<9x256xf32, #tpu.memory_space<vmem>>, vector<9x256xf32>
    %c0_5 = arith.constant 0 : index
    %c0_6 = arith.constant 0 : index
    %c0_7 = arith.constant 0 : index
    %3 = vector.load %arg1[%c0_5, %c0_6, %c0_7] : memref<1x8x256xf32, #tpu.memory_space<vmem>>, vector<1x8x256xf32>
    %4 = vector.shape_cast %3 : vector<1x8x256xf32> to vector<8x256xf32>
    %c17_i32 = arith.constant 17 : i32
    %5 = tpu.dynamic_rotate %4 by %c17_i32 dim 1 : vector<8x256xf32>, i32 -> vector<8x256xf32>
    %6 = vector.extract_strided_slice %2 {offsets = [0, 0], sizes = [1, 256], strides = [1, 1]} : vector<9x256xf32> to vector<1x256xf32>
    %7 = vector.broadcast %6 : vector<1x256xf32> to vector<8x256xf32>
    %8 = arith.mulf %5, %7 : vector<8x256xf32>
    %c0_8 = arith.constant 0 : index
    %c0_9 = arith.constant 0 : index
    %9 = vector.load %arg6[%c0_8, %c0_9] : memref<72x256xf32, #tpu.memory_space<vmem>>, vector<8x256xf32>
    tpu.vector_store %arg6[%c0_8, %c0_9], %8 {strides = array<i32>} : memref<72x256xf32, #tpu.memory_space<vmem>>, vector<8x256xf32>,
    %c16_i32 = arith.constant 16 : i32
    %10 = tpu.dynamic_rotate %4 by %c16_i32 dim 1 : vector<8x256xf32>, i32 -> vector<8x256xf32>
    %11 = vector.extract_strided_slice %2 {offsets = [1, 0], sizes = [1, 256], strides = [1, 1]} : vector<9x256xf32> to vector<1x256xf32>
    %12 = vector.broadcast %11 : vector<1x256xf32> to vector<8x256xf32>
    %13 = arith.mulf %10, %12 : vector<8x256xf32>
    %c8 = arith.constant 8 : index
    %c0_10 = arith.constant 0 : index
    %14 = vector.load %arg6[%c8, %c0_10] : memref<72x256xf32, #tpu.memory_space<vmem>>, vector<8x256xf32>
    tpu.vector_store %arg6[%c8, %c0_10], %13 {strides = array<i32>} : memref<72x256xf32, #tpu.memory_space<vmem>>, vector<8x256xf32>,
    %c15_i32 = arith.constant 15 : i32
    %15 = tpu.dynamic_rotate %4 by %c15_i32 dim 1 : vector<8x256xf32>, i32 -> vector<8x256xf32>
    %16 = vector.extract_strided_slice %2 {offsets = [2, 0], sizes = [1, 256], strides = [1, 1]} : vector<9x256xf32> to vector<1x256xf32>
    %17 = vector.broadcast %16 : vector<1x256xf32> to vector<8x256xf32>
    %18 = arith.mulf %15, %17 : vector<8x256xf32>
    %c16 = arith.constant 16 : index
    %c0_11 = arith.constant 0 : index
    %19 = vector.load %arg6[%c16, %c0_11] : memref<72x256xf32, #tpu.memory_space<vmem>>, vector<8x256xf32>
    tpu.vector_store %arg6[%c16, %c0_11], %18 {strides = array<i32>} : memref<72x256xf32, #tpu.memory_space<vmem>>, vector<8x256xf32>,
    %c1_i32 = arith.constant 1 : i32
    %20 = tpu.dynamic_rotate %4 by %c1_i32 dim 1 : vector<8x256xf32>, i32 -> vector<8x256xf32>
    %21 = vector.extract_strided_slice %2 {offsets = [3, 0], sizes = [1, 256], strides = [1, 1]} : vector<9x256xf32> to vector<1x256xf32>
    %22 = vector.broadcast %21 : vector<1x256xf32> to vector<8x256xf32>
    %23 = arith.mulf %20, %22 : vector<8x256xf32>
    %c24 = arith.constant 24 : index
    %c0_12 = arith.constant 0 : index
    %24 = vector.load %arg6[%c24, %c0_12] : memref<72x256xf32, #tpu.memory_space<vmem>>, vector<8x256xf32>
    tpu.vector_store %arg6[%c24, %c0_12], %23 {strides = array<i32>} : memref<72x256xf32, #tpu.memory_space<vmem>>, vector<8x256xf32>,
    %c32 = arith.constant 32 : index
    %c0_13 = arith.constant 0 : index
    %25 = vector.load %arg6[%c32, %c0_13] : memref<72x256xf32, #tpu.memory_space<vmem>>, vector<8x256xf32>
    tpu.vector_store %arg6[%c32, %c0_13], %4 {strides = array<i32>} : memref<72x256xf32, #tpu.memory_space<vmem>>, vector<8x256xf32>,
    %c255_i32 = arith.constant 255 : i32
    %26 = tpu.dynamic_rotate %4 by %c255_i32 dim 1 : vector<8x256xf32>, i32 -> vector<8x256xf32>
    %27 = vector.extract_strided_slice %2 {offsets = [5, 0], sizes = [1, 256], strides = [1, 1]} : vector<9x256xf32> to vector<1x256xf32>
    %28 = vector.broadcast %27 : vector<1x256xf32> to vector<8x256xf32>
    %29 = arith.mulf %26, %28 : vector<8x256xf32>
    %c40 = arith.constant 40 : index
    %c0_14 = arith.constant 0 : index
    %30 = vector.load %arg6[%c40, %c0_14] : memref<72x256xf32, #tpu.memory_space<vmem>>, vector<8x256xf32>
    tpu.vector_store %arg6[%c40, %c0_14], %29 {strides = array<i32>} : memref<72x256xf32, #tpu.memory_space<vmem>>, vector<8x256xf32>,
    %c241_i32 = arith.constant 241 : i32
    %31 = tpu.dynamic_rotate %4 by %c241_i32 dim 1 : vector<8x256xf32>, i32 -> vector<8x256xf32>
    %32 = vector.extract_strided_slice %2 {offsets = [6, 0], sizes = [1, 256], strides = [1, 1]} : vector<9x256xf32> to vector<1x256xf32>
    %33 = vector.broadcast %32 : vector<1x256xf32> to vector<8x256xf32>
    %34 = arith.mulf %31, %33 : vector<8x256xf32>
    %c48 = arith.constant 48 : index
    %c0_15 = arith.constant 0 : index
    %35 = vector.load %arg6[%c48, %c0_15] : memref<72x256xf32, #tpu.memory_space<vmem>>, vector<8x256xf32>
    tpu.vector_store %arg6[%c48, %c0_15], %34 {strides = array<i32>} : memref<72x256xf32, #tpu.memory_space<vmem>>, vector<8x256xf32>,
    %c240_i32 = arith.constant 240 : i32
    %36 = tpu.dynamic_rotate %4 by %c240_i32 dim 1 : vector<8x256xf32>, i32 -> vector<8x256xf32>
    %37 = vector.extract_strided_slice %2 {offsets = [7, 0], sizes = [1, 256], strides = [1, 1]} : vector<9x256xf32> to vector<1x256xf32>
    %38 = vector.broadcast %37 : vector<1x256xf32> to vector<8x256xf32>
    %39 = arith.mulf %36, %38 : vector<8x256xf32>
    %c56 = arith.constant 56 : index
    %c0_16 = arith.constant 0 : index
    %40 = vector.load %arg6[%c56, %c0_16] : memref<72x256xf32, #tpu.memory_space<vmem>>, vector<8x256xf32>
    tpu.vector_store %arg6[%c56, %c0_16], %39 {strides = array<i32>} : memref<72x256xf32, #tpu.memory_space<vmem>>, vector<8x256xf32>,
    %c239_i32 = arith.constant 239 : i32
    %41 = tpu.dynamic_rotate %4 by %c239_i32 dim 1 : vector<8x256xf32>, i32 -> vector<8x256xf32>
    %42 = vector.extract_strided_slice %2 {offsets = [8, 0], sizes = [1, 256], strides = [1, 1]} : vector<9x256xf32> to vector<1x256xf32>
    %43 = vector.broadcast %42 : vector<1x256xf32> to vector<8x256xf32>
    %44 = arith.mulf %41, %43 : vector<8x256xf32>
    %c64 = arith.constant 64 : index
    %c0_17 = arith.constant 0 : index
    %45 = vector.load %arg6[%c64, %c0_17] : memref<72x256xf32, #tpu.memory_space<vmem>>, vector<8x256xf32>
    tpu.vector_store %arg6[%c64, %c0_17], %44 {strides = array<i32>} : memref<72x256xf32, #tpu.memory_space<vmem>>, vector<8x256xf32>,
    %c0_18 = arith.constant 0 : index
    %c0_19 = arith.constant 0 : index
    %46 = vector.load %arg6[%c0_18, %c0_19] : memref<72x256xf32, #tpu.memory_space<vmem>>, vector<72x256xf32>
    %cst = arith.constant dense<0.000000e+00> : vector<8x256xf32>
    %47 = tpu.matmul %0, %46, %cst {dimension_numbers = #tpu.dot_dimension_numbers<[1], [0], [0], [1], [0, 0, 1, 1], [], []>, precision = #tpu.contract_precision<fp32>} : vector<8x72xf32>, vector<72x256xf32>, vector<8x256xf32> -> vector<8x256xf32>
    %cst_20 = arith.constant dense<0.000000e+00> : vector<8xf32>
    %48 = vector.multi_reduction <add>, %47, %cst_20 [1] : vector<8x256xf32> to vector<8xf32>
    %49 = vector.shape_cast %48 : vector<8xf32> to vector<8x1xf32>
    %50 = arith.mulf %47, %47 : vector<8x256xf32>
    %cst_21 = arith.constant dense<0.000000e+00> : vector<8xf32>
    %51 = vector.multi_reduction <add>, %50, %cst_21 [1] : vector<8x256xf32> to vector<8xf32>
    %52 = vector.shape_cast %51 : vector<8xf32> to vector<8x1xf32>
    %cst_22 = arith.constant 3.906250e-03 : f32
    %53 = vector.broadcast %cst_22 : f32 to vector<8x1xf32>
    %54 = arith.mulf %49, %53 : vector<8x1xf32>
    %cst_23 = arith.constant 3.906250e-03 : f32
    %55 = vector.broadcast %cst_23 : f32 to vector<8x1xf32>
    %56 = arith.mulf %52, %55 : vector<8x1xf32>
    %57 = arith.mulf %54, %54 : vector<8x1xf32>
    %58 = arith.subf %56, %57 : vector<8x1xf32>
    %cst_24 = arith.constant 0.000000e+00 : f32
    %59 = vector.broadcast %cst_24 : f32 to vector<8x1xf32>
    %60 = arith.maximumf %58, %59 : vector<8x1xf32>
    %61 = vector.broadcast %54 : vector<8x1xf32> to vector<8x256xf32>
    %62 = arith.subf %47, %61 : vector<8x256xf32>
    %cst_25 = arith.constant 9.99999974E-6 : f32
    %63 = vector.broadcast %cst_25 : f32 to vector<8x1xf32>
    %64 = arith.addf %60, %63 : vector<8x1xf32>
    %65 = math.rsqrt %64 : vector<8x1xf32>
    %66 = vector.broadcast %65 : vector<8x1xf32> to vector<8x256xf32>
    %67 = arith.mulf %62, %66 : vector<8x256xf32>
    %cst_26 = arith.constant 0.000000e+00 : f32
    %68 = vector.broadcast %cst_26 : f32 to vector<8x256xf32>
    %69 = arith.cmpf oge, %67, %68 : vector<8x256xf32>
    %cst_27 = arith.constant 2.000000e-01 : f32
    %70 = vector.broadcast %cst_27 : f32 to vector<8x256xf32>
    %71 = arith.mulf %70, %67 : vector<8x256xf32>
    %72 = arith.select %69, %67, %71 : vector<8x256xi1>, vector<8x256xf32>
    %c17_i32_28 = arith.constant 17 : i32
    %73 = tpu.dynamic_rotate %72 by %c17_i32_28 dim 1 : vector<8x256xf32>, i32 -> vector<8x256xf32>
    %74 = vector.extract_strided_slice %2 {offsets = [0, 0], sizes = [1, 256], strides = [1, 1]} : vector<9x256xf32> to vector<1x256xf32>
    %75 = vector.broadcast %74 : vector<1x256xf32> to vector<8x256xf32>
    %76 = arith.mulf %73, %75 : vector<8x256xf32>
    %c0_29 = arith.constant 0 : index
    %c0_30 = arith.constant 0 : index
    %77 = vector.load %arg6[%c0_29, %c0_30] : memref<72x256xf32, #tpu.memory_space<vmem>>, vector<8x256xf32>
    tpu.vector_store %arg6[%c0_29, %c0_30], %76 {strides = array<i32>} : memref<72x256xf32, #tpu.memory_space<vmem>>, vector<8x256xf32>,
    %c16_i32_31 = arith.constant 16 : i32
    %78 = tpu.dynamic_rotate %72 by %c16_i32_31 dim 1 : vector<8x256xf32>, i32 -> vector<8x256xf32>
    %79 = vector.extract_strided_slice %2 {offsets = [1, 0], sizes = [1, 256], strides = [1, 1]} : vector<9x256xf32> to vector<1x256xf32>
    %80 = vector.broadcast %79 : vector<1x256xf32> to vector<8x256xf32>
    %81 = arith.mulf %78, %80 : vector<8x256xf32>
    %c8_32 = arith.constant 8 : index
    %c0_33 = arith.constant 0 : index
    %82 = vector.load %arg6[%c8_32, %c0_33] : memref<72x256xf32, #tpu.memory_space<vmem>>, vector<8x256xf32>
    tpu.vector_store %arg6[%c8_32, %c0_33], %81 {strides = array<i32>} : memref<72x256xf32, #tpu.memory_space<vmem>>, vector<8x256xf32>,
    %c15_i32_34 = arith.constant 15 : i32
    %83 = tpu.dynamic_rotate %72 by %c15_i32_34 dim 1 : vector<8x256xf32>, i32 -> vector<8x256xf32>
    %84 = vector.extract_strided_slice %2 {offsets = [2, 0], sizes = [1, 256], strides = [1, 1]} : vector<9x256xf32> to vector<1x256xf32>
    %85 = vector.broadcast %84 : vector<1x256xf32> to vector<8x256xf32>
    %86 = arith.mulf %83, %85 : vector<8x256xf32>
    %c16_35 = arith.constant 16 : index
    %c0_36 = arith.constant 0 : index
    %87 = vector.load %arg6[%c16_35, %c0_36] : memref<72x256xf32, #tpu.memory_space<vmem>>, vector<8x256xf32>
    tpu.vector_store %arg6[%c16_35, %c0_36], %86 {strides = array<i32>} : memref<72x256xf32, #tpu.memory_space<vmem>>, vector<8x256xf32>,
    %c1_i32_37 = arith.constant 1 : i32
    %88 = tpu.dynamic_rotate %72 by %c1_i32_37 dim 1 : vector<8x256xf32>, i32 -> vector<8x256xf32>
    %89 = vector.extract_strided_slice %2 {offsets = [3, 0], sizes = [1, 256], strides = [1, 1]} : vector<9x256xf32> to vector<1x256xf32>
    %90 = vector.broadcast %89 : vector<1x256xf32> to vector<8x256xf32>
    %91 = arith.mulf %88, %90 : vector<8x256xf32>
    %c24_38 = arith.constant 24 : index
    %c0_39 = arith.constant 0 : index
    %92 = vector.load %arg6[%c24_38, %c0_39] : memref<72x256xf32, #tpu.memory_space<vmem>>, vector<8x256xf32>
    tpu.vector_store %arg6[%c24_38, %c0_39], %91 {strides = array<i32>} : memref<72x256xf32, #tpu.memory_space<vmem>>, vector<8x256xf32>,
    %c32_40 = arith.constant 32 : index
    %c0_41 = arith.constant 0 : index
    %93 = vector.load %arg6[%c32_40, %c0_41] : memref<72x256xf32, #tpu.memory_space<vmem>>, vector<8x256xf32>
    tpu.vector_store %arg6[%c32_40, %c0_41], %72 {strides = array<i32>} : memref<72x256xf32, #tpu.memory_space<vmem>>, vector<8x256xf32>,
    %c255_i32_42 = arith.constant 255 : i32
    %94 = tpu.dynamic_rotate %72 by %c255_i32_42 dim 1 : vector<8x256xf32>, i32 -> vector<8x256xf32>
    %95 = vector.extract_strided_slice %2 {offsets = [5, 0], sizes = [1, 256], strides = [1, 1]} : vector<9x256xf32> to vector<1x256xf32>
    %96 = vector.broadcast %95 : vector<1x256xf32> to vector<8x256xf32>
    %97 = arith.mulf %94, %96 : vector<8x256xf32>
    %c40_43 = arith.constant 40 : index
    %c0_44 = arith.constant 0 : index
    %98 = vector.load %arg6[%c40_43, %c0_44] : memref<72x256xf32, #tpu.memory_space<vmem>>, vector<8x256xf32>
    tpu.vector_store %arg6[%c40_43, %c0_44], %97 {strides = array<i32>} : memref<72x256xf32, #tpu.memory_space<vmem>>, vector<8x256xf32>,
    %c241_i32_45 = arith.constant 241 : i32
    %99 = tpu.dynamic_rotate %72 by %c241_i32_45 dim 1 : vector<8x256xf32>, i32 -> vector<8x256xf32>
    %100 = vector.extract_strided_slice %2 {offsets = [6, 0], sizes = [1, 256], strides = [1, 1]} : vector<9x256xf32> to vector<1x256xf32>
    %101 = vector.broadcast %100 : vector<1x256xf32> to vector<8x256xf32>
    %102 = arith.mulf %99, %101 : vector<8x256xf32>
    %c48_46 = arith.constant 48 : index
    %c0_47 = arith.constant 0 : index
    %103 = vector.load %arg6[%c48_46, %c0_47] : memref<72x256xf32, #tpu.memory_space<vmem>>, vector<8x256xf32>
    tpu.vector_store %arg6[%c48_46, %c0_47], %102 {strides = array<i32>} : memref<72x256xf32, #tpu.memory_space<vmem>>, vector<8x256xf32>,
    %c240_i32_48 = arith.constant 240 : i32
    %104 = tpu.dynamic_rotate %72 by %c240_i32_48 dim 1 : vector<8x256xf32>, i32 -> vector<8x256xf32>
    %105 = vector.extract_strided_slice %2 {offsets = [7, 0], sizes = [1, 256], strides = [1, 1]} : vector<9x256xf32> to vector<1x256xf32>
    %106 = vector.broadcast %105 : vector<1x256xf32> to vector<8x256xf32>
    %107 = arith.mulf %104, %106 : vector<8x256xf32>
    %c56_49 = arith.constant 56 : index
    %c0_50 = arith.constant 0 : index
    %108 = vector.load %arg6[%c56_49, %c0_50] : memref<72x256xf32, #tpu.memory_space<vmem>>, vector<8x256xf32>
    tpu.vector_store %arg6[%c56_49, %c0_50], %107 {strides = array<i32>} : memref<72x256xf32, #tpu.memory_space<vmem>>, vector<8x256xf32>,
    %c239_i32_51 = arith.constant 239 : i32
    %109 = tpu.dynamic_rotate %72 by %c239_i32_51 dim 1 : vector<8x256xf32>, i32 -> vector<8x256xf32>
    %110 = vector.extract_strided_slice %2 {offsets = [8, 0], sizes = [1, 256], strides = [1, 1]} : vector<9x256xf32> to vector<1x256xf32>
    %111 = vector.broadcast %110 : vector<1x256xf32> to vector<8x256xf32>
    %112 = arith.mulf %109, %111 : vector<8x256xf32>
    %c64_52 = arith.constant 64 : index
    %c0_53 = arith.constant 0 : index
    %113 = vector.load %arg6[%c64_52, %c0_53] : memref<72x256xf32, #tpu.memory_space<vmem>>, vector<8x256xf32>
    tpu.vector_store %arg6[%c64_52, %c0_53], %112 {strides = array<i32>} : memref<72x256xf32, #tpu.memory_space<vmem>>, vector<8x256xf32>,
    %c0_54 = arith.constant 0 : index
    %c0_55 = arith.constant 0 : index
    %114 = vector.load %arg6[%c0_54, %c0_55] : memref<72x256xf32, #tpu.memory_space<vmem>>, vector<72x256xf32>
    %cst_56 = arith.constant dense<0.000000e+00> : vector<8x256xf32>
    %115 = tpu.matmul %1, %114, %cst_56 {dimension_numbers = #tpu.dot_dimension_numbers<[1], [0], [0], [1], [0, 0, 1, 1], [], []>, precision = #tpu.contract_precision<fp32>} : vector<8x72xf32>, vector<72x256xf32>, vector<8x256xf32> -> vector<8x256xf32>
    %cst_57 = arith.constant dense<0.000000e+00> : vector<8xf32>
    %116 = vector.multi_reduction <add>, %115, %cst_57 [1] : vector<8x256xf32> to vector<8xf32>
    %117 = vector.shape_cast %116 : vector<8xf32> to vector<8x1xf32>
    %118 = arith.mulf %115, %115 : vector<8x256xf32>
    %cst_58 = arith.constant dense<0.000000e+00> : vector<8xf32>
    %119 = vector.multi_reduction <add>, %118, %cst_58 [1] : vector<8x256xf32> to vector<8xf32>
    %120 = vector.shape_cast %119 : vector<8xf32> to vector<8x1xf32>
    %cst_59 = arith.constant 3.906250e-03 : f32
    %121 = vector.broadcast %cst_59 : f32 to vector<8x1xf32>
    %122 = arith.mulf %117, %121 : vector<8x1xf32>
    %cst_60 = arith.constant 3.906250e-03 : f32
    %123 = vector.broadcast %cst_60 : f32 to vector<8x1xf32>
    %124 = arith.mulf %120, %123 : vector<8x1xf32>
    %125 = arith.mulf %122, %122 : vector<8x1xf32>
    %126 = arith.subf %124, %125 : vector<8x1xf32>
    %cst_61 = arith.constant 0.000000e+00 : f32
    %127 = vector.broadcast %cst_61 : f32 to vector<8x1xf32>
    %128 = arith.maximumf %126, %127 : vector<8x1xf32>
    %129 = vector.broadcast %122 : vector<8x1xf32> to vector<8x256xf32>
    %130 = arith.subf %115, %129 : vector<8x256xf32>
    %cst_62 = arith.constant 9.99999974E-6 : f32
    %131 = vector.broadcast %cst_62 : f32 to vector<8x1xf32>
    %132 = arith.addf %128, %131 : vector<8x1xf32>
    %133 = math.rsqrt %132 : vector<8x1xf32>
    %134 = vector.broadcast %133 : vector<8x1xf32> to vector<8x256xf32>
    %135 = arith.mulf %130, %134 : vector<8x256xf32>
    %136 = arith.addf %4, %135 : vector<8x256xf32>
    %cst_63 = arith.constant 0.000000e+00 : f32
    %137 = vector.broadcast %cst_63 : f32 to vector<8x256xf32>
    %138 = arith.cmpf oge, %136, %137 : vector<8x256xf32>
    %cst_64 = arith.constant 2.000000e-01 : f32
    %139 = vector.broadcast %cst_64 : f32 to vector<8x256xf32>
    %140 = arith.mulf %139, %136 : vector<8x256xf32>
    %141 = arith.select %138, %136, %140 : vector<8x256xi1>, vector<8x256xf32>
    %c0_65 = arith.constant 0 : index
    %c0_66 = arith.constant 0 : index
    %c0_67 = arith.constant 0 : index
    %142 = vector.load %arg5[%c0_65, %c0_66, %c0_67] : memref<1x8x256xf32, #tpu.memory_space<vmem>>, vector<1x8x256xf32>
    %143 = vector.shape_cast %142 : vector<1x8x256xf32> to vector<8x256xf32>
    %144 = vector.shape_cast %141 : vector<8x256xf32> to vector<1x8x256xf32>
    tpu.vector_store %arg5[%c0_65, %c0_66, %c0_67], %144 {strides = array<i32>} : memref<1x8x256xf32, #tpu.memory_space<vmem>>, vector<1x8x256xf32>,
    return
  }
  func.func @transform_0(%arg0: i32) -> (i32, i32, i32) {
    %c0_i32 = arith.constant 0 : i32
    %c0_i32_0 = arith.constant 0 : i32
    %c0_i32_1 = arith.constant 0 : i32
    return %arg0, %c0_i32, %c0_i32_0 : i32, i32, i32
  }
  func.func @transform_1(%arg0: i32) -> (i32, i32) {
    %c0_i32 = arith.constant 0 : i32
    %c0_i32_0 = arith.constant 0 : i32
    %c0_i32_1 = arith.constant 0 : i32
    return %c0_i32, %c0_i32_0 : i32, i32
  }
  func.func @transform_2(%arg0: i32) -> (i32, i32) {
    %c0_i32 = arith.constant 0 : i32
    %c0_i32_0 = arith.constant 0 : i32
    %c0_i32_1 = arith.constant 0 : i32
    return %c0_i32, %c0_i32_0 : i32, i32
  }
  func.func @transform_3(%arg0: i32) -> (i32, i32) {
    %c0_i32 = arith.constant 0 : i32
    %c0_i32_0 = arith.constant 0 : i32
    %c0_i32_1 = arith.constant 0 : i32
    return %c0_i32, %c0_i32_0 : i32, i32
  }
  func.func @transform_4(%arg0: i32) -> (i32, i32, i32) {
    %c0_i32 = arith.constant 0 : i32
    %c0_i32_0 = arith.constant 0 : i32
    %c0_i32_1 = arith.constant 0 : i32
    return %arg0, %c0_i32, %c0_i32_0 : i32, i32, i32
  }
}

</mosaic_0001>

<bundles_post_ra>
// kernel: resnet_block.1
= control target key start
LH: loop header
LB: loop body
LE: loop exit
PB: predicated region body
PF: predicated region fallthrough
CT: control target
= control target key end

     0   :  { %s2234_s15 = smov 0   ;;  %s3020_s0 = inlined_call_operand.vmem [shape: f32[2,8,256], index: 0, kind: input, shape index: {}]   ;;  %s3021_s1 = inlined_call_operand.vmem [shape: f32[8,72], index: 1, kind: input, shape index: {}]   ;;  %s3022_s2 = inlined_call_operand.vmem [shape: f32[8,72], index: 2, kind: input, shape index: {}]   ;;  %s3023_s3 = inlined_call_operand.vmem [shape: f32[9,256], index: 3, kind: input, shape index: {}]   ;;  %s3024_s4 = inlined_call_operand.vmem [shape: f32[2,8,256], index: 4, kind: output, shape index: {}]  }
   0x1 LB: > { %s1942_s16 = sadd.s32 4294967295, %s2198_s15   ;;  %p1946_p0 = scmp.ge.s32.totalorder %s2198_s15, 1  ;;  %s2198_s15 = sphi %s2234_s15, %s14_s15  }
   0x2   : > { %p162_p1 = scmp.lt.s32.totalorder %s2198_s15, 3 }
   0x4   : > { %p163_p2 = pnand %p1946_p0, %p162_p1 }
   0x6   : > { %166 = sbr.rel (%p163_p2) target bundleno = 1272 (0x4f8), region = 36 }
   0xd   : > { %p188_p3 = scmp.lt.s32.totalorder %s1942_s16, 1  ;;  %s2200_s21 = smov 16   ;;  %v3031_v2 = vmov 0.0   ;;  %v210_v3 = vlaneseq  ;;  %v2301_v8 = vld [vmem:[%s3023_s3] sm:$0xff]  ;;  %v2306_v9 = vld [vmem:[%s3023_s3 + $0x8] sm:$0xff]  ;;  %vm380_vm2 = vcmask 588800  }
   0xe   : > { %s2201_s22 = smov 17   ;;  %s2202_s23 = smov 15   ;;  %466 = vmatprep.mubr.f32.mxu0 %v3031_v2  ;;  %1267 = vmatprep.mubr.f32.mxu1 %v3031_v2  ;;  %v198_v28 = vld [vmem:[%s3021_s1] sm:$0xff] }
   0xf   : > { %s3089_s16 = smov (!%p188_p3, %s1942_s16), 1  ;;  %s2203_s24 = smov 1   ;;  %v2292_v4 = vshrl.u32 %v210_v3, 7  ;;  %v2294_v5 = vand.u32 127, %v210_v3  ;;  %v382_v40 = vsel %vm380_vm2, %v198_v28, 0 }
  0x10   : > { %s1955_s17 = sshll.u32 %s3089_s16, 4  ;;  %s2204_s25 = smov 127   ;;  %v2381_v53 = vand.u32 4294901760, %v382_v40 }
  0x11   : > { %s2250_s20 = scalar_lea.vmem %s3020_s0, %s1955_s17  ;;  %s2205_s26 = smov 113   ;;  %v236_v6 = vsub.s32 1, %v2292_v4  ;;  %v217_v7 = vsub.s32 0, %v2292_v4  ;;  %vm231_vm0 = vcmp.lt.s32.totalorder %v2294_v5, 16  ;;  %vm212_vm1 = vcmp.lt.s32.totalorder %v2294_v5, 17 }
  0x12   : > { %v2253_v0 = vld [vmem:[%s2250_s20] sm:$0xff]  ;;  %v2260_v1 = vld [vmem:[%s2250_s20 + $0x8] sm:$0xff]  ;;  %s2206_s27 = smov 112   ;;  %s2208_s28 = smov 111   ;;  %v255_v16 = vsub.s32 2, %v2292_v4  ;;  %v274_v19 = vsub.s32 3, %v2292_v4 }
  0x13   : > { %227 = vrot.lane.b32.xlu1 %v2253_v0, %s2200_s21  ;;  %206 = vrot.lane.b32.xlu0 %v2253_v0, %s2201_s22  ;;  %v2311_v12 = vrot.slane %v2301_v8, %v236_v6  ;;  %v2314_v13 = vrot.slane %v2306_v9, %v236_v6  ;;  %v2317_v14 = vrot.slane %v2301_v8, %v217_v7  ;;  %vm250_vm3 = vcmp.lt.s32.totalorder %v2294_v5, 15 }
  0x14   : > { %v2320_v15 = vrot.slane %v2306_v9, %v217_v7  ;;  %v2343_v29 = vrot.slane %v2301_v8, %v255_v16  ;;  %v295_v30 = vsub.s32 5, %v2292_v4  ;;  %v400_v31 = vand.u32 4294901760, %v2260_v1 }
  0x15   : > { %v2349_v38 = vrot.slane %v2306_v9, %v255_v16  ;;  %vm269_vm4 = vcmp.lt.s32.totalorder %v2294_v5, 1  ;;  %v2353_v39 = vrot.slane %v2301_v8, %v274_v19  ;;  %v2361_v43 = vrot.slane %v2306_v9, %v274_v19 }
  0x16   : > { %vm290_vm5 = vcmp.lt.s32.totalorder %v2294_v5, 127  ;;  %v314_v46 = vsub.s32 6, %v2292_v4  ;;  %v402_v47 = vand.u32 4294901760, %v2253_v0  ;;  %v2371_v50 = vrot.slane %v2301_v8, %v295_v30 }
  0x17   : > { %229 = vrot.lane.b32.xlu1 %v2260_v1, %s2200_s21  ;;  %208 = vrot.lane.b32.xlu0 %v2260_v1, %s2201_s22  ;;  %v2374_v51 = vrot.slane %v2306_v9, %v295_v30  ;;  %v2379_v52 = vsub.f32 %v2260_v1, %v400_v31  ;;  %vm309_vm6 = vcmp.lt.s32.totalorder %v2294_v5, 113  ;;  %v333_v60 = vsub.s32 7, %v2292_v4 }
  0x18   : > { %v2398_v61 = vrot.slane %v2301_v8, %v314_v46  ;;  %v2401_v62 = vrot.slane %v2306_v9, %v314_v46  ;;  %vm328_vm7 = vcmp.lt.s32.totalorder %v2294_v5, 112  ;;  %v2405_v63 = vsub.f32 %v2253_v0, %v402_v47 }
  0x19   : > { %v3025_v4 = vand.u32 4294901760, %v2379_v52  ;;  %vm347_vm8 = vcmp.lt.s32.totalorder %v2294_v5, 111 }
  0x1a   : > { %3046 = vst [vmem:[#allocation3_spill] sm:$0xff] %v2398_v61  ;;  %3047 = vst [vmem:[#allocation4_spill] sm:$0xff] %v2401_v62 }
  0x1b   : > { %248 = vrot.lane.b32.xlu1 %v2260_v1, %s2202_s23  ;;  %246 = vrot.lane.b32.xlu0 %v2253_v0, %s2202_s23 }
  0x1f   : > { %267 = vrot.lane.b32.xlu1 %v2260_v1, %s2203_s24  ;;  %265 = vrot.lane.b32.xlu0 %v2253_v0, %s2203_s24 }
  0x23   : > { %288 = vrot.lane.b32.xlu1 %v2260_v1, %s2204_s25  ;;  %286 = vrot.lane.b32.xlu0 %v2253_v0, %s2204_s25 }
  0x27   : > { %307 = vrot.lane.b32.xlu1 %v2260_v1, %s2205_s26  ;;  %305 = vrot.lane.b32.xlu0 %v2253_v0, %s2205_s26 }
  0x2b   : > { %326 = vrot.lane.b32.xlu1 %v2260_v1, %s2206_s27  ;;  %324 = vrot.lane.b32.xlu0 %v2253_v0, %s2206_s27 }
  0x2f   : > { %345 = vrot.lane.b32.xlu1 %v2260_v1, %s2208_s28  ;;  %343 = vrot.lane.b32.xlu0 %v2253_v0, %s2208_s28 }
  0x85   : > { %v228_v10 = vpop.permute.xlu1 %227  ;;  %v207_v11 = vpop.permute.xlu0 %206 }
  0x89   : > { %v230_v17 = vpop.permute.xlu1 %229  ;;  %v209_v18 = vpop.permute.xlu0 %208 }
  0x8a   : > { %v232_v20 = vsel %vm231_vm0, %v228_v10, %v230_v17  ;;  %v233_v21 = vsel %vm231_vm0, %v230_v17, %v228_v10  ;;  %v213_v22 = vsel %vm212_vm1, %v207_v11, %v209_v18  ;;  %v214_v23 = vsel %vm212_vm1, %v209_v18, %v207_v11 }
  0x8b   : > { %v242_v24 = vmul.f32 %v2311_v12, %v233_v21  ;;  %v2334_v25 = vmul.f32 %v2314_v13, %v232_v20  ;;  %v223_v26 = vmul.f32 %v2317_v14, %v214_v23  ;;  %v224_v27 = vmul.f32 %v2320_v15, %v213_v22 }
  0x8c   : > { %v2408_v11 = vsub.f32 %v382_v40, %v2381_v53  ;;  %v2421_v22 = vrot.slane %v2301_v8, %v333_v60  ;;  %v2437_v8 = vrot.slane %v2306_v9, %v333_v60 }
  0x8d   : > { %v388_v32 = vand.u32 4294901760, %v2334_v25  ;;  %v390_v33 = vand.u32 4294901760, %v242_v24  ;;  %v384_v34 = vand.u32 4294901760, %v224_v27  ;;  %v386_v35 = vand.u32 4294901760, %v223_v26  ;;  %v249_v36 = vpop.permute.xlu1 %248  ;;  %v247_v37 = vpop.permute.xlu0 %246 }
  0x8e   : > { %v251_v41 = vsel %vm250_vm3, %v247_v37, %v249_v36  ;;  %v252_v42 = vsel %vm250_vm3, %v249_v36, %v247_v37  ;;  %3048 = vst [vmem:[#allocation5_spill] sm:$0xff] %v2421_v22  ;;  %3049 = vst [vmem:[#allocation6_spill] sm:$0xff] %v2437_v8 }
  0x8f   : > { %v2364_v44 = vpack.c.bf16 %v388_v32, %v384_v34  ;;  %v2366_v45 = vpack.c.bf16 %v390_v33, %v386_v35  ;;  %v2384_v54 = vmul.f32 %v2343_v29, %v252_v42  ;;  %v262_v55 = vmul.f32 %v2349_v38, %v251_v41 }
  0x90   : > { %v2416_v0 = vsub.f32 %v242_v24, %v390_v33  ;;  %v2423_v23 = vsub.f32 %v224_v27, %v384_v34  ;;  %v2425_v28 = vsub.f32 %v223_v26, %v386_v35  ;;  %v2432_v37 = vsub.f32 %v2334_v25, %v388_v32 }
  0x91   : > { %v268_v48 = vpop.permute.xlu1 %267  ;;  %v266_v49 = vpop.permute.xlu0 %265  ;;  %1958 = vmatprep.subr.bf16.mxu0 %v2364_v44  ;;  %v392_v16 = vand.u32 4294901760, %v262_v55  ;;  %v394_v17 = vand.u32 4294901760, %v2384_v54  ;;  %v3026_v42 = vand.u32 4294901760, %v2408_v11  ;;  %v2443_v26 = vsub.f32 %v2379_v52, %v3025_v4 }
  0x92   : > { %v270_v56 = vsel %vm269_vm4, %v266_v49, %v268_v48  ;;  %v271_v57 = vsel %vm269_vm4, %v268_v48, %v266_v49  ;;  %1960 = vmatpush1.bf16.msra.mxu0 %v2366_v45  ;;  %v3027_v27 = vand.u32 4294901760, %v2416_v0  ;;  %v3028_v35 = vand.u32 4294901760, %v2425_v28 }
  0x93   : > { %v280_v58 = vmul.f32 %v2353_v39, %v271_v57  ;;  %v281_v59 = vmul.f32 %v2361_v43, %v270_v56  ;;  %v3030_v49 = vand.u32 4294901760, %v2423_v23  ;;  %v2462_v56 = vsub.f32 %v262_v55, %v392_v16 }
  0x95   : > { %v396_v3 = vand.u32 4294901760, %v281_v59  ;;  %v398_v6 = vand.u32 4294901760, %v280_v58  ;;  %v289_v7 = vpop.permute.xlu1 %288  ;;  %v287_v10 = vpop.permute.xlu0 %286 }
  0x96   : > { %v291_v18 = vsel %vm290_vm5, %v287_v10, %v289_v7  ;;  %v292_v19 = vsel %vm290_vm5, %v289_v7, %v287_v10  ;;  %v2470_v7 = vsub.f32 %v2408_v11, %v3026_v42 }
  0x97   : > { %v301_v20 = vmul.f32 %v2371_v50, %v291_v18  ;;  %v302_v21 = vmul.f32 %v2374_v51, %v292_v19  ;;  %v2427_v30 = vpack.c.bf16 %v396_v3, %v392_v16  ;;  %v2429_v36 = vpack.c.bf16 %v398_v6, %v394_v17 }
  0x98   : > { %v2447_v32 = vsub.f32 %v281_v59, %v396_v3  ;;  %v2464_v57 = vsub.f32 %v280_v58, %v398_v6  ;;  %v3029_v3 = vand.u32 4294901760, %v2432_v37  ;;  %v499_v18 = vsub.f32 %v2416_v0, %v3027_v27 }
  0x99   : > { %v404_v24 = vand.u32 4294901760, %v302_v21  ;;  %v406_v33 = vand.u32 4294901760, %v301_v20  ;;  %v308_v40 = vpop.permute.xlu1 %307  ;;  %v306_v41 = vpop.permute.xlu0 %305  ;;  %1962 = vmatprep.subr.bf16.mxu0 %v2427_v30  ;;  %v487_v19 = vsub.f32 %v2425_v28, %v3028_v35 }
  0x9a   : > { %v310_v34 = vsel %vm309_vm6, %v306_v41, %v308_v40  ;;  %v311_v9 = vsel %vm309_vm6, %v308_v40, %v306_v41  ;;  %1964 = vmatpush1.bf16.msra.mxu0 %v2429_v36  ;;  %v3035_v16 = vand.u32 4294901760, %v2447_v32  ;;  %v2492_v40 = vsub.f32 %v2384_v54, %v394_v17 }
  0x9b   : > { %v2457_v46 = vpack.c.bf16 %v404_v24, %v400_v31  ;;  %v2459_v48 = vpack.c.bf16 %v406_v33, %v402_v47  ;;  %v320_v1 = vmul.f32 %v2398_v61, %v310_v34  ;;  %v321_v31 = vmul.f32 %v2401_v62, %v311_v9  ;;  %v2500_v9 = vld [vmem:[%s3023_s3 + $0x18] ss:$0 sm:$0xff] }
  0x9c   : > { %v2479_v58 = vsub.f32 %v302_v21, %v404_v24  ;;  %v481_v21 = vsub.f32 %v2423_v23, %v3030_v49  ;;  %3050 = vst [vmem:[#allocation7_spill] sm:$0xff] %v2500_v9  ;;  %v2516_v35 = vsub.f32 %v301_v20, %v406_v33  ;;  %v488_v33 = vand.u32 4294901760, %v487_v19 }
  0x9d   : > { %v327_v59 = vpop.permute.xlu1 %326  ;;  %v325_v60 = vpop.permute.xlu0 %324  ;;  %1966 = vmatprep.subr.bf16.mxu0 %v2457_v46  ;;  %v408_v17 = vand.u32 4294901760, %v321_v31  ;;  %v471_v19 = vand.u32 4294901760, %v2470_v7 }
  0x9e   : > { %v329_v47 = vsel %vm328_vm7, %v325_v60, %v327_v59  ;;  %v330_v55 = vsel %vm328_vm7, %v327_v59, %v325_v60  ;;  %1968 = vmatpush1.bf16.msra.mxu0 %v2459_v48  ;;  %v493_v60 = vsub.f32 %v2432_v37, %v3029_v3  ;;  %v517_v3 = vsub.f32 %v2447_v32, %v3035_v16 }
  0x9f   : > { %v339_v6 = vmul.f32 %v2421_v22, %v329_v47  ;;  %v340_v10 = vmul.f32 %v2437_v8, %v330_v55  ;;  %v410_v47 = vand.u32 4294901760, %v320_v1  ;;  %v2509_v55 = vld [vmem:[%s3023_s3 + $0x10] ss:$0 sm:$0xff]  ;;  %v482_v20 = vand.u32 4294901760, %v481_v21 }
  0xa0   : > { %3051 = vst [vmem:[#allocation8_spill] sm:$0xff] %v2509_v55  ;;  %v2531_v27 = vsub.f32 %v321_v31, %v408_v17  ;;  %v3052_v16 = vand.u32 4294901760, %v2462_v56  ;;  %v500_v31 = vand.u32 4294901760, %v499_v18  ;;  %v518_v21 = vand.u32 4294901760, %v517_v3 }
  0xa1   : > { %v412_v24 = vand.u32 4294901760, %v340_v10  ;;  %v414_v41 = vand.u32 4294901760, %v339_v6  ;;  %v346_v34 = vpop.permute.xlu1 %345  ;;  %v344_v59 = vpop.permute.xlu0 %343  ;;  %v3056_v18 = vand.u32 4294901760, %v2405_v63 }
  0xa2   : > { %v348_v4 = vsel %vm347_vm8, %v344_v59, %v346_v34  ;;  %v349_v42 = vsel %vm347_vm8, %v346_v34, %v344_v59 }
  0xa3   : > { %v2522_v2 = vsub.f32 %v340_v10, %v412_v24  ;;  %v359_v25 = vmul.f32 %v2500_v9, %v349_v42  ;;  %v2525_v54 = vpack.c.bf16 %v412_v24, %v408_v17  ;;  %v2527_v8 = vpack.c.bf16 %v414_v41, %v410_v47 }
  0xa4   : > { %v358_v59 = vmul.f32 %v2509_v55, %v348_v4  ;;  %v494_v10 = vand.u32 4294901760, %v493_v60  ;;  %v505_v42 = vsub.f32 %v2462_v56, %v3052_v16  ;;  %v3053_v24 = vand.u32 4294901760, %v2464_v57 }
  0xa5   : > { %v2533_v22 = vand.u32 4294901760, %v359_v25  ;;  %1970 = vmatprep.subr.bf16.mxu0 %v2525_v54  ;;  %v2543_v4 = vsub.f32 %v339_v6, %v414_v41  ;;  %v3054_v60 = vand.u32 4294901760, %v2479_v58  ;;  %v2555_v6 = vsub.f32 %v320_v1, %v410_v47 }
  0xa6   : > { %v523_v49 = vsub.f32 %v2464_v57, %v3053_v24  ;;  %1972 = vmatpush1.bf16.msra.mxu0 %v2527_v8  ;;  %v3055_v24 = vand.u32 4294901760, %v2492_v40  ;;  %v2557_v41 = vand.u32 4294901760, %v358_v59  ;;  %v535_v55 = vsub.f32 %v2405_v63, %v3056_v18 }
  0xa7   : > { %417 = vmatprep.subr.mxu0 %v2533_v22  ;;  %v541_v16 = vsub.f32 %v2479_v58, %v3054_v60  ;;  %v1973_v7 = vpack.c.bf16 %v494_v10, %v482_v20  ;;  %v506_v3 = vand.u32 4294901760, %v505_v42  ;;  %v530_v9 = vand.u32 4294901760, %v2443_v26 }
  0xa8   : > { %v511_v34 = vsub.f32 %v2492_v40, %v3055_v24  ;;  %v3040_v60 = vand.u32 4294901760, %v2531_v27  ;;  %v3057_v17 = vand.u32 4294901760, %v2516_v35  ;;  %v1975_v1 = vpack.c.bf16 %v500_v31, %v488_v33 }
  0xa9   : > { %v524_v47 = vand.u32 4294901760, %v523_v49  ;;  %v2570_v62 = vsub.f32 %v359_v25, %v2533_v22  ;;  %v1977_v20 = vpack.c.bf16 %v518_v21, %v506_v3  ;;  %v542_v10 = vand.u32 4294901760, %v541_v16 }
  0xaa   : > { %v547_v61 = vsub.f32 %v2516_v35, %v3057_v17  ;;  %419 = vmatpush1.msra.mxu0 %v2557_v41  ;;  %v3058_v26 = vand.u32 4294901760, %v2522_v2  ;;  %v558_v18 = vand.u32 4294901760, %v2555_v6  ;;  %v512_v17 = vand.u32 4294901760, %v511_v34 }
  0xab   : > { %1974 = vmatprep.subr.bf16.mxu0 %v1973_v7  ;;  %472 = vmatmul.mubr.f32.vlgmr.msra.gmra.mrb[0].mxu0 %v471_v19  ;;  %v3059_v24 = vmov 0.0   ;;  %v536_v33 = vand.u32 4294901760, %v535_v55  ;;  %v553_v25 = vsub.f32 %v2531_v27, %v3040_v60  ;;  %v3060_v49 = vand.u32 4294901760, %v2543_v4 }
  0xac   : > { %v565_v42 = vsub.f32 %v2522_v2, %v3058_v26  ;;  %1976 = vmatpush1.bf16.msra.mxu0 %v1975_v1  ;;  %632 = vmatprep.mubr.f32.mxu0 %v3059_v24  ;;  %v2584_v19 = vsub.f32 %v358_v59, %v2557_v41  ;;  %v1979_v21 = vpack.c.bf16 %v524_v47, %v512_v17  ;;  %v548_v16 = vand.u32 4294901760, %v547_v61 }
  0xad   : > { %1978 = vmatprep.subr.bf16.mxu0 %v1977_v20  ;;  %v571_v31 = vsub.f32 %v2543_v4, %v3060_v49  ;;  %v1981_v7 = vpack.c.bf16 %v542_v10, %v530_v9  ;;  %v576_v34 = vand.u32 4294901760, %v2570_v62  ;;  %v559_v55 = vsub.f32 %v2555_v6, %v558_v18 }
  0xae   : > { %v566_v3 = vand.u32 4294901760, %v565_v42  ;;  %v554_v1 = vand.u32 4294901760, %v553_v25  ;;  %v582_v20 = vand.u32 4294901760, %v2584_v19  ;;  %v1983_v26 = vpack.c.bf16 %v548_v16, %v536_v33 }
  0xaf   : > { %v572_v49 = vand.u32 4294901760, %v571_v31  ;;  %v577_v61 = vsub.f32 %v2570_v62, %v576_v34  ;;  %v560_v9 = vand.u32 4294901760, %v559_v55  ;;  %v1989_v17 = vpack.c.bf16 %v2432_v37, %v2423_v23 }
  0xb0   : > { %1980 = vmatpush1.bf16.msra.mxu0 %v1979_v21  ;;  %v1985_v60 = vpack.c.bf16 %v566_v3, %v554_v1  ;;  %v583_v47 = vsub.f32 %v2584_v19, %v582_v20  ;;  %v1991_v33 = vpack.c.bf16 %v2416_v0, %v2425_v28  ;;  %v1995_v25 = vpack.c.bf16 %v2464_v57, %v2492_v40 }
  0xb1   : > { %1982 = vmatprep.subr.bf16.mxu0 %v1981_v7  ;;  %v1987_v59 = vpack.c.bf16 %v572_v49, %v560_v9  ;;  %v578_v10 = vand.u32 4294901760, %v577_v61  ;;  %v1997_v31 = vpack.c.bf16 %v2479_v58, %v2379_v52  ;;  %v1999_v21 = vpack.c.bf16 %v2516_v35, %v2405_v63 }
  0xb2   : > { %v584_v42 = vand.u32 4294901760, %v583_v47  ;;  %v2001_v16 = vpack.c.bf16 %v2522_v2, %v2531_v27  ;;  %v2003_v7 = vpack.c.bf16 %v2543_v4, %v2555_v6  ;;  %v3061_v3 = vand.u32 4294901760, %v2423_v23 }
  0xb3   : > { %v3062_v55 = vand.u32 4294901760, %v2432_v37  ;;  %v3064_v49 = vand.u32 4294901760, %v2416_v0  ;;  %v3065_v9 = vand.u32 4294901760, %v2408_v11  ;;  %v3067_v47 = vand.u32 4294901760, %v2447_v32 }
  0xb4   : > { %1984 = vmatpush1.bf16.msra.mxu0 %v1983_v26  ;;  %v3063_v26 = vand.u32 4294901760, %v2425_v28  ;;  %v3068_v23 = vand.u32 4294901760, %v2492_v40  ;;  %v3069_v28 = vand.u32 4294901760, %v2464_v57  ;;  %v3070_v0 = vand.u32 4294901760, %v2379_v52 }
  0xb5   : > { %1986 = vmatprep.subr.bf16.mxu0 %v1985_v60  ;;  %v1993_v60 = vpack.c.bf16 %v2447_v32, %v2462_v56  ;;  %v2021_v1 = vpack.c.bf16 %v3062_v55, %v3061_v3  ;;  %v3073_v32 = vand.u32 4294901760, %v2516_v35  ;;  %v3076_v52 = vand.u32 4294901760, %v2543_v4 }
  0xb6   : > { %v2023_v61 = vpack.c.bf16 %v3064_v49, %v3063_v26  ;;  %v2027_v37 = vpack.c.bf16 %v3069_v28, %v3068_v23 }
  0xb7   : > { %v2035_v57 = vpack.c.bf16 %v3076_v52, %v558_v18 }
  0xb8   : > { %1988 = vmatpush1.bf16.msra.mxu0 %v1987_v59  ;;  %v3066_v59 = vand.u32 4294901760, %v2462_v56  ;;  %v3072_v56 = vand.u32 4294901760, %v2405_v63 }
  0xb9   : > { %579 = vmatprep.subr.mxu0 %v578_v10 }
  0xba   : > { %v2025_v10 = vpack.c.bf16 %v3067_v47, %v3066_v59  ;;  %v199_v59 = vld [vmem:[%s3022_s2] sm:$0xff] }
  0xbc   : > { %585 = vmatpush1.msra.mxu0 %v584_v42  ;;  %v3071_v42 = vand.u32 4294901760, %v2479_v58 }
  0xbd   : > { %1990 = vmatprep.subr.bf16.mxu0 %v1989_v17  ;;  %634 = vmatmul.mubr.f32.vlgmr.msra.gmra.mrb[0].mxu0 %v2381_v53  ;;  %v2031_v17 = vpack.c.bf16 %v3073_v32, %v3072_v56 }
  0xbe   : > { %1992 = vmatpush1.bf16.msra.mxu0 %v1991_v33  ;;  %740 = vmatprep.mubr.f32.mxu0 %v3059_v24  ;;  %v3074_v33 = vand.u32 4294901760, %v2531_v27 }
  0xbf   : > { %1994 = vmatprep.subr.bf16.mxu0 %v1993_v60  ;;  %v3075_v60 = vand.u32 4294901760, %v2522_v2 }
  0xc1   : > { %v2033_v40 = vpack.c.bf16 %v3075_v60, %v3074_v33 }
  0xc2   : > { %1996 = vmatpush1.bf16.msra.mxu0 %v1995_v25 }
  0xc3   : > { %1998 = vmatprep.subr.bf16.mxu0 %v1997_v31 }
  0xc6   : > { %2000 = vmatpush1.bf16.msra.mxu0 %v1999_v21 }
  0xc7   : > { %2002 = vmatprep.subr.bf16.mxu0 %v2001_v16 }
  0xca   : > { %2004 = vmatpush1.bf16.msra.mxu0 %v2003_v7 }
  0xcb   : > { %690 = vmatprep.subr.mxu0 %v2570_v62 }
  0xce   : > { %693 = vmatpush1.msra.mxu0 %v2584_v19 }
  0xcf   : > { %2006 = vmatprep.subr.bf16.mxu0 %v2364_v44  ;;  %743 = vmatmul.mubr.f32.vlgmr.msra.gmra.mrb[0].mxu0 %v2408_v11  ;;  %v2029_v11 = vpack.c.bf16 %v3071_v42, %v3070_v0 }
  0xd0   : > { %2008 = vmatpush1.bf16.msra.mxu0 %v2366_v45  ;;  %831 = vmatprep.mubr.f32.mxu0 %v3059_v24 }
  0xd1   : > { %2010 = vmatprep.subr.bf16.mxu0 %v2427_v30 }
  0xd4   : > { %2012 = vmatpush1.bf16.msra.mxu0 %v2429_v36 }
  0xd5   : > { %2014 = vmatprep.subr.bf16.mxu0 %v2457_v46 }
  0xd8   : > { %2016 = vmatpush1.bf16.msra.mxu0 %v2459_v48 }
  0xd9   : > { %2018 = vmatprep.subr.bf16.mxu0 %v2525_v54 }
  0xdc   : > { %2020 = vmatpush1.bf16.msra.mxu0 %v2527_v8 }
  0xdd   : > { %782 = vmatprep.subr.mxu0 %v2533_v22 }
  0xe0   : > { %784 = vmatpush1.msra.mxu0 %v2557_v41 }
  0xe1   : > { %2022 = vmatprep.subr.bf16.mxu0 %v2021_v1  ;;  %835 = vmatmul.mubr.f32.vlgmr.msra.gmra.mrb[0].mxu0 %v3065_v9 }
  0xe2   : > { %2024 = vmatpush1.bf16.msra.mxu0 %v2023_v61  ;;  %959 = vmatprep.mubr.f32.mxu0 %v3059_v24 }
  0xe3   : > { %2026 = vmatprep.subr.bf16.mxu0 %v2025_v10 }
  0xe6   : > { %2028 = vmatpush1.bf16.msra.mxu0 %v2027_v37  ;;  %v1183_v37 = vsel %vm380_vm2, %v199_v59, 0 }
  0xe7   : > { %2030 = vmatprep.subr.bf16.mxu0 %v2029_v11  ;;  %v2741_v32 = vand.u32 4294901760, %v1183_v37 }
  0xea   : > { %2032 = vmatpush1.bf16.msra.mxu0 %v2031_v17 }
  0xeb   : > { %2034 = vmatprep.subr.bf16.mxu0 %v2033_v40 }
  0xee   : > { %2036 = vmatpush1.bf16.msra.mxu0 %v2035_v57 }
  0xef   : > { %908 = vmatprep.subr.mxu0 %v576_v34 }
  0xf2   : > { %912 = vmatpush1.msra.mxu0 %v582_v20 }
  0xf3   : > { %2038 = vmatprep.subr.bf16.mxu0 %v2364_v44  ;;  %961 = vmatmul.mubr.f32.vlgmr.msra.gmra.mrb[0].mxu0 %v2381_v53 }
  0xf4   : > { %2040 = vmatpush1.bf16.msra.mxu0 %v2366_v45  ;;  %1049 = vmatprep.mubr.f32.mxu0 %v3059_v24 }
  0xf5   : > { %2042 = vmatprep.subr.bf16.mxu0 %v2427_v30 }
  0xf8   : > { %2044 = vmatpush1.bf16.msra.mxu0 %v2429_v36 }
  0xf9   : > { %2046 = vmatprep.subr.bf16.mxu0 %v2457_v46 }
  0xfc   : > { %2048 = vmatpush1.bf16.msra.mxu0 %v2459_v48 }
  0xfd   : > { %2050 = vmatprep.subr.bf16.mxu0 %v2525_v54 }
 0x100   : > { %2052 = vmatpush1.bf16.msra.mxu0 %v2527_v8 }
 0x101   : > { %1000 = vmatprep.subr.mxu0 %v2533_v22 }
 0x104   : > { %1002 = vmatpush1.msra.mxu0 %v2557_v41 }
 0x105   : > { %1051 = vmatmul.mubr.f32.vlgmr.msra.gmra.mrb[0].mxu0 %v2381_v53 }
 0x1d8   : > { %v1052_v2 = vpop.f32.mrb[0].mxu0 }
 0x1d9   : > { %v1054_v44 = vpop.f32.mrb[1].mxu0  ;;  %v1060_v45 = vmul.f32 %v1052_v2, %v1052_v2 }
 0x1da   : > { %v1061_v62 = vmul.f32 %v1054_v44, %v1054_v44  ;;  %v1057_v63 = vadd.f32 %v1054_v44, %v1052_v2 }
 0x1dc   : > { %1058 = vadd.xlane.f32.xlu0 %v1057_v63  ;;  %v1062_v30 = vadd.f32 %v1061_v62, %v1060_v45  ;;  %v2756_v63 = vsub.f32 %v1183_v37, %v2741_v32  ;;  %v3079_v37 = vld [vmem:[#allocation5_spill] sm:$0xff] }
 0x1de   : > { %1063 = vadd.xlane.f32.xlu1 %v1062_v30 }
 0x269   : > { %v1059_v36 = vpop.xlane.xlu0 %1058 }
 0x26a   : > { %v1065_v27 = vmul.f32 0.00390625, %v1059_v36 }
 0x26b   : > { %v1064_v35 = vpop.xlane.xlu1 %1063 }
 0x26c   : > { %v1066_v46 = vmul.f32 0.00390625, %v1064_v35  ;;  %v1067_v48 = vmul.f32 %v1065_v27, %v1065_v27  ;;  %v1070_v54 = vsub.f32 %v1052_v2, %v1065_v27  ;;  %v1071_v4 = vsub.f32 %v1054_v44, %v1065_v27 }
 0x26e   : > { %v1068_v8 = vsub.f32 %v1066_v46, %v1067_v48 }
 0x270   : > { %v1069_v58 = vmax.f32 %v1068_v8, 0.0 }
 0x272   : > { %v1072_v22 = vadd.f32 1e-05, %v1069_v58 }
 0x274   : > { %2186 = vrsqrt.f32 %v1072_v22 }
 0x27e   : > { %v2187_v53 = vpop.eup %2186 }
 0x27f   : > { %v1074_v6 = vmul.f32 %v2187_v53, %v1070_v54  ;;  %v1075_v41 = vmul.f32 %v2187_v53, %v1071_v4 }
 0x281   : > { %vm1076_vm9 = vcmp.ge.f32.partialorder %v1074_v6, 0.0  ;;  %vm1077_vm10 = vcmp.ge.f32.partialorder %v1075_v41, 0.0  ;;  %v1078_v18 = vmul.f32 0.2, %v1074_v6  ;;  %v1079_v19 = vmul.f32 0.2, %v1075_v41 }
 0x283   : > { %v2681_v34 = vsel %vm1076_vm9, %v1074_v6, %v1078_v18  ;;  %v2683_v20 = vsel %vm1077_vm10, %v1075_v41, %v1079_v19 }
 0x284   : > { %1084 = vrot.lane.b32.xlu1 %v2683_v20, %s2201_s22  ;;  %1082 = vrot.lane.b32.xlu0 %v2681_v34, %s2201_s22  ;;  %v1201_v2 = vand.u32 4294901760, %v2683_v20 }
 0x286   : > { %v2766_v46 = vsub.f32 %v2683_v20, %v1201_v2 }
 0x288   : > { %1094 = vrot.lane.b32.xlu1 %v2683_v20, %s2200_s21  ;;  %1092 = vrot.lane.b32.xlu0 %v2681_v34, %s2200_s21  ;;  %s197_s21 = scalar_lea.vmem %s3024_s4, %s1955_s17 }
 0x28c   : > { %1104 = vrot.lane.b32.xlu1 %v2683_v20, %s2202_s23  ;;  %1102 = vrot.lane.b32.xlu0 %v2681_v34, %s2202_s23 }
 0x290   : > { %1114 = vrot.lane.b32.xlu1 %v2683_v20, %s2203_s24  ;;  %1112 = vrot.lane.b32.xlu0 %v2681_v34, %s2203_s24 }
 0x294   : > { %1126 = vrot.lane.b32.xlu1 %v2683_v20, %s2204_s25  ;;  %1124 = vrot.lane.b32.xlu0 %v2681_v34, %s2204_s25 }
 0x298   : > { %1136 = vrot.lane.b32.xlu1 %v2683_v20, %s2205_s26  ;;  %1134 = vrot.lane.b32.xlu0 %v2681_v34, %s2205_s26 }
 0x29c   : > { %1146 = vrot.lane.b32.xlu1 %v2683_v20, %s2206_s27  ;;  %1144 = vrot.lane.b32.xlu0 %v2681_v34, %s2206_s27 }
 0x2a0   : > { %1156 = vrot.lane.b32.xlu1 %v2683_v20, %s2208_s28  ;;  %1154 = vrot.lane.b32.xlu0 %v2681_v34, %s2208_s28 }
 0x2f6   : > { %v1085_v25 = vpop.permute.xlu1 %1084  ;;  %v1083_v31 = vpop.permute.xlu0 %1082 }
 0x2f7   : > { %v1086_v21 = vsel %vm212_vm1, %v1083_v31, %v1085_v25  ;;  %v1087_v16 = vsel %vm212_vm1, %v1085_v25, %v1083_v31  ;;  %v1329_v31 = vand.u32 4294901760, %v2766_v46 }
 0x2f8   : > { %v1088_v55 = vmul.f32 %v1087_v16, %v2317_v14  ;;  %v1089_v1 = vmul.f32 %v1086_v21, %v2320_v15 }
 0x2fa   : > { %v1095_v7 = vpop.permute.xlu1 %1094  ;;  %v1093_v3 = vpop.permute.xlu0 %1092  ;;  %v1185_v28 = vand.u32 4294901760, %v1089_v1  ;;  %v1187_v15 = vand.u32 4294901760, %v1088_v55 }
 0x2fb   : > { %v1096_v26 = vsel %vm231_vm0, %v1093_v3, %v1095_v7  ;;  %v1097_v49 = vsel %vm231_vm0, %v1095_v7, %v1093_v3 }
 0x2fc   : > { %v1098_v61 = vmul.f32 %v1097_v49, %v2311_v12  ;;  %v1099_v9 = vmul.f32 %v1096_v26, %v2314_v13  ;;  %v2762_v27 = vsub.f32 %v1089_v1, %v1185_v28  ;;  %v2781_v18 = vsub.f32 %v1088_v55, %v1187_v15  ;;  %v3077_v1 = vld [vmem:[#allocation4_spill] sm:$0xff] }
 0x2fe   : > { %v1189_v47 = vand.u32 4294901760, %v1099_v9  ;;  %v1191_v10 = vand.u32 4294901760, %v1098_v61  ;;  %v1105_v23 = vpop.permute.xlu1 %1104  ;;  %v1103_v14 = vpop.permute.xlu0 %1102  ;;  %v1281_v25 = vand.u32 4294901760, %v2762_v27 }
 0x2ff   : > { %v1106_v0 = vsel %vm250_vm3, %v1103_v14, %v1105_v23  ;;  %v1107_v12 = vsel %vm250_vm3, %v1105_v23, %v1103_v14 }
 0x300   : > { %v2737_v42 = vpack.c.bf16 %v1189_v47, %v1185_v28  ;;  %v2739_v13 = vpack.c.bf16 %v1191_v10, %v1187_v15  ;;  %v1108_v17 = vmul.f32 %v1107_v12, %v2343_v29  ;;  %v1109_v33 = vmul.f32 %v1106_v0, %v2349_v38 }
 0x301   : > { %v1203_v29 = vand.u32 4294901760, %v2681_v34  ;;  %v2771_v8 = vsub.f32 %v1098_v61, %v1191_v10  ;;  %v2778_v4 = vsub.f32 %v1099_v9, %v1189_v47  ;;  %v1287_v47 = vand.u32 4294901760, %v2781_v18  ;;  %v3078_v10 = vld [vmem:[#allocation3_spill] sm:$0xff] }
 0x302   : > { %v1115_v11 = vpop.permute.xlu1 %1114  ;;  %v1113_v56 = vpop.permute.xlu0 %1112  ;;  %2054 = vmatprep.subr.bf16.mxu1 %v2737_v42  ;;  %v1193_v30 = vand.u32 4294901760, %v1109_v33  ;;  %v1195_v36 = vand.u32 4294901760, %v1108_v17  ;;  %v1282_v12 = vsub.f32 %v2762_v27, %v1281_v25 }
 0x303   : > { %v1116_v60 = vsel %vm269_vm4, %v1113_v56, %v1115_v11  ;;  %v1117_v40 = vsel %vm269_vm4, %v1115_v11, %v1113_v56  ;;  %2056 = vmatpush1.bf16.msra.mxu1 %v2739_v13  ;;  %v2769_v48 = vsub.f32 %v2681_v34, %v1203_v29  ;;  %v1299_v21 = vand.u32 4294901760, %v2771_v8 }
 0x304   : > { %v1118_v52 = vmul.f32 %v1117_v40, %v2353_v39  ;;  %v1119_v57 = vmul.f32 %v1116_v60, %v2361_v43  ;;  %v2799_v55 = vsub.f32 %v1109_v33, %v1193_v30  ;;  %v1293_v9 = vand.u32 4294901760, %v2778_v4  ;;  %v3080_v40 = vld [vmem:[#allocation6_spill] sm:$0xff] }
 0x305   : > { %v1335_v3 = vand.u32 4294901760, %v2769_v48  ;;  %v1300_v56 = vsub.f32 %v2771_v8, %v1299_v21  ;;  %v2826_v33 = vsub.f32 %v1108_v17, %v1195_v36  ;;  %v1288_v5 = vsub.f32 %v2781_v18, %v1287_v47 }
 0x306   : > { %v1197_v44 = vand.u32 4294901760, %v1119_v57  ;;  %v1199_v38 = vand.u32 4294901760, %v1118_v52  ;;  %v1127_v45 = vpop.permute.xlu1 %1126  ;;  %v1125_v62 = vpop.permute.xlu0 %1124 }
 0x307   : > { %v1128_v39 = vsel %vm290_vm5, %v1125_v62, %v1127_v45  ;;  %v1129_v43 = vsel %vm290_vm5, %v1127_v45, %v1125_v62  ;;  %v1305_v45 = vand.u32 4294901760, %v2799_v55 }
 0x308   : > { %v1130_v35 = vmul.f32 %v1128_v39, %v2371_v50  ;;  %v1131_v58 = vmul.f32 %v1129_v43, %v2374_v51  ;;  %v2774_v22 = vpack.c.bf16 %v1197_v44, %v1193_v30  ;;  %v2776_v54 = vpack.c.bf16 %v1199_v38, %v1195_v36 }
 0x309   : > { %v1270_v50 = vand.u32 4294901760, %v2756_v63  ;;  %v2786_v51 = vsub.f32 %v1119_v57, %v1197_v44  ;;  %v2815_v15 = vsub.f32 %v1118_v52, %v1199_v38  ;;  %v1294_v38 = vsub.f32 %v2778_v4, %v1293_v9 }
 0x30a   : > { %v1207_v53 = vand.u32 4294901760, %v1130_v35  ;;  %v1137_v6 = vpop.permute.xlu1 %1136  ;;  %v1135_v41 = vpop.permute.xlu0 %1134  ;;  %v1205_v19 = vand.u32 4294901760, %v1131_v58  ;;  %2058 = vmatprep.subr.bf16.mxu1 %v2774_v22 }
 0x30b   : > { %v1139_v34 = vsel %vm309_vm6, %v1137_v6, %v1135_v41  ;;  %v1138_v20 = vsel %vm309_vm6, %v1135_v41, %v1137_v6  ;;  %2060 = vmatpush1.bf16.msra.mxu1 %v2776_v54  ;;  %v2806_v59 = vsub.f32 %v2756_v63, %v1270_v50  ;;  %v1317_v11 = vand.u32 4294901760, %v2786_v51 }
 0x30c   : > { %v2794_v16 = vpack.c.bf16 %v1205_v19, %v1201_v2  ;;  %v2796_v7 = vpack.c.bf16 %v1207_v53, %v1203_v29  ;;  %v1141_v26 = vmul.f32 %v1139_v34, %v3077_v1  ;;  %v1140_v23 = vmul.f32 %v1138_v20, %v3078_v10 }
 0x30d   : > { %v2828_v60 = vsub.f32 %v1131_v58, %v1205_v19  ;;  %v1323_v39 = vand.u32 4294901760, %v2815_v15  ;;  %v2840_v43 = vsub.f32 %v1130_v35, %v1207_v53  ;;  %v3081_v58 = vld [vmem:[#allocation7_spill] sm:$0xff]  ;;  %v1318_v41 = vsub.f32 %v2786_v51, %v1317_v11  ;;  %v3082_v53 = vld [vmem:[#allocation8_spill] sm:$0xff] }
 0x30e   : > { %v1147_v49 = vpop.permute.xlu1 %1146  ;;  %v1145_v61 = vpop.permute.xlu0 %1144  ;;  %2062 = vmatprep.subr.bf16.mxu1 %v2794_v16  ;;  %v1209_v57 = vand.u32 4294901760, %v1141_v26  ;;  %v1211_v62 = vand.u32 4294901760, %v1140_v23  ;;  %v1311_v35 = vand.u32 4294901760, %v2826_v33 }
 0x30f   : > { %v1148_v14 = vsel %vm328_vm7, %v1145_v61, %v1147_v49  ;;  %v1149_v28 = vsel %vm328_vm7, %v1147_v49, %v1145_v61  ;;  %2064 = vmatpush1.bf16.msra.mxu1 %v2796_v7  ;;  %v3041_v1 = vand.u32 4294901760, %v2828_v60 }
 0x310   : > { %v1150_v0 = vmul.f32 %v1148_v14, %v3079_v37  ;;  %v1151_v52 = vmul.f32 %v1149_v28, %v3080_v40  ;;  %v2860_v10 = vsub.f32 %v1141_v26, %v1209_v57  ;;  %v1295_v14 = vand.u32 4294901760, %v1294_v38 }
 0x311   : > { %v1272_v28 = vand.u32 4294901760, %v2806_v59  ;;  %v1306_v37 = vsub.f32 %v2799_v55, %v1305_v45  ;;  %v1324_v40 = vsub.f32 %v2815_v15, %v1323_v39  ;;  %v1301_v26 = vand.u32 4294901760, %v1300_v56 }
 0x312   : > { %v1215_v2 = vand.u32 4294901760, %v1150_v0  ;;  %v1157_v29 = vpop.permute.xlu1 %1156  ;;  %v1155_v44 = vpop.permute.xlu0 %1154  ;;  %v1213_v30 = vand.u32 4294901760, %v1151_v52  ;;  %v1342_v59 = vsub.f32 %v2828_v60, %v3041_v1 }
 0x313   : > { %v1158_v17 = vsel %vm347_vm8, %v1155_v44, %v1157_v29  ;;  %v1159_v36 = vsel %vm347_vm8, %v1157_v29, %v1155_v44  ;;  %v1319_v44 = vand.u32 4294901760, %v1318_v41 }
 0x314   : > { %v1161_v6 = vmul.f32 %v3081_v58, %v1159_v36  ;;  %v2846_v19 = vsub.f32 %v1151_v52, %v1213_v30  ;;  %v2848_v34 = vpack.c.bf16 %v1213_v30, %v1209_v57  ;;  %v2850_v20 = vpack.c.bf16 %v1215_v2, %v1211_v62 }
 0x315   : > { %v1160_v49 = vmul.f32 %v3082_v53, %v1158_v17  ;;  %v3042_v52 = vand.u32 4294901760, %v2840_v43  ;;  %v2871_v29 = vsub.f32 %v1150_v0, %v1215_v2  ;;  %v1283_v57 = vand.u32 4294901760, %v1282_v12 }
 0x316   : > { %v2858_v61 = vand.u32 4294901760, %v1161_v6  ;;  %2066 = vmatprep.subr.bf16.mxu1 %v2848_v34  ;;  %v3043_v38 = vand.u32 4294901760, %v2846_v19  ;;  %v1312_v30 = vsub.f32 %v2826_v33, %v1311_v35  ;;  %v2882_v17 = vsub.f32 %v1140_v23, %v1211_v62 }
 0x317   : > { %2068 = vmatpush1.bf16.msra.mxu1 %v2850_v20  ;;  %v2884_v0 = vand.u32 4294901760, %v1160_v49  ;;  %v1289_v2 = vand.u32 4294901760, %v1288_v5  ;;  %v2069_v56 = vpack.c.bf16 %v1295_v14, %v1283_v57  ;;  %v1307_v36 = vand.u32 4294901760, %v1306_v37 }
 0x318   : > { %1218 = vmatprep.subr.mxu1 %v2858_v61  ;;  %v1330_v12 = vsub.f32 %v2766_v46, %v1329_v31  ;;  %v3045_v58 = vand.u32 4294901760, %v2860_v10  ;;  %v1348_v41 = vsub.f32 %v2840_v43, %v3042_v52  ;;  %v3044_v53 = vand.u32 4294901760, %v2871_v29 }
 0x319   : > { %v2071_v23 = vpack.c.bf16 %v1301_v26, %v1289_v2  ;;  %v1325_v62 = vand.u32 4294901760, %v1324_v40  ;;  %v2896_v5 = vsub.f32 %v1161_v6, %v2858_v61  ;;  %v2073_v14 = vpack.c.bf16 %v1319_v44, %v1307_v36 }
 0x31a   : > { %v1343_v37 = vand.u32 4294901760, %v1342_v59  ;;  %v1366_v57 = vsub.f32 %v2846_v19, %v3043_v38  ;;  %v1359_v1 = vand.u32 4294901760, %v2882_v17  ;;  %v1313_v52 = vand.u32 4294901760, %v1312_v30 }
 0x31b   : > { %1220 = vmatpush1.msra.mxu1 %v2884_v0  ;;  %v1336_v26 = vsub.f32 %v2769_v48, %v1335_v3  ;;  %v1331_v6 = vand.u32 4294901760, %v1330_v12  ;;  %v1372_v40 = vsub.f32 %v2871_v29, %v3044_v53  ;;  %v2913_v44 = vsub.f32 %v1160_v49, %v2884_v0 }
 0x31c   : > { %2070 = vmatprep.subr.bf16.mxu1 %v2069_v56  ;;  %1273 = vmatmul.mubr.f32.vlgmr.msra.gmra.mrb[0].mxu1 %v1272_v28  ;;  %v1354_v28 = vsub.f32 %v2860_v10, %v3045_v58  ;;  %v2075_v59 = vpack.c.bf16 %v1325_v62, %v1313_v52  ;;  %v1349_v30 = vand.u32 4294901760, %v1348_v41  ;;  %v1367_v56 = vand.u32 4294901760, %v1366_v57 }
 0x31d   : > { %2072 = vmatpush1.bf16.msra.mxu1 %v2071_v23  ;;  %1433 = vmatprep.mubr.f32.mxu1 %v3059_v24  ;;  %v2077_v2 = vpack.c.bf16 %v1343_v37, %v1331_v6  ;;  %v1377_v36 = vand.u32 4294901760, %v2896_v5  ;;  %v1360_v12 = vsub.f32 %v2882_v17, %v1359_v1  ;;  %v1337_v23 = vand.u32 4294901760, %v1336_v26 }
 0x31e   : > { %2074 = vmatprep.subr.bf16.mxu1 %v2073_v14  ;;  %v1355_v14 = vand.u32 4294901760, %v1354_v28  ;;  %v1383_v38 = vand.u32 4294901760, %v2913_v44  ;;  %v1373_v58 = vand.u32 4294901760, %v1372_v40  ;;  %v2085_v6 = vpack.c.bf16 %v2778_v4, %v2762_v27 }
 0x31f   : > { %v2079_v53 = vpack.c.bf16 %v1349_v30, %v1337_v23  ;;  %v1378_v52 = vsub.f32 %v2896_v5, %v1377_v36  ;;  %v1361_v41 = vand.u32 4294901760, %v1360_v12  ;;  %v2087_v28 = vpack.c.bf16 %v2771_v8, %v2781_v18 }
 0x320   : > { %v2081_v49 = vpack.c.bf16 %v1367_v56, %v1355_v14  ;;  %v1384_v37 = vsub.f32 %v2913_v44, %v1383_v38  ;;  %v2093_v40 = vpack.c.bf16 %v2828_v60, %v2766_v46  ;;  %v2097_v30 = vpack.c.bf16 %v2846_v19, %v2860_v10 }
 0x321   : > { %2076 = vmatpush1.bf16.msra.mxu1 %v2075_v59  ;;  %v2083_v62 = vpack.c.bf16 %v1373_v58, %v1361_v41  ;;  %v1379_v57 = vand.u32 4294901760, %v1378_v52  ;;  %v2089_v58 = vpack.c.bf16 %v2786_v51, %v2799_v55  ;;  %v2095_v59 = vpack.c.bf16 %v2840_v43, %v2769_v48 }
 0x322   : > { %2078 = vmatprep.subr.bf16.mxu1 %v2077_v2  ;;  %v1385_v26 = vand.u32 4294901760, %v1384_v37  ;;  %v2099_v2 = vpack.c.bf16 %v2871_v29, %v2882_v17  ;;  %v2117_v56 = vpack.c.bf16 %v1293_v9, %v1281_v25  ;;  %v2119_v12 = vpack.c.bf16 %v1299_v21, %v1287_v47 }
 0x323   : > { %v2121_v23 = vpack.c.bf16 %v1317_v11, %v1305_v45  ;;  %v2123_v27 = vpack.c.bf16 %v1323_v39, %v1311_v35  ;;  %v3083_v8 = vand.u32 4294901760, %v2828_v60  ;;  %v3084_v4 = vand.u32 4294901760, %v2840_v43  ;;  %v2190_v39 = vld [vmem:[%s2250_s20] sm:$0xff] }
 0x324   : > { %v3085_v18 = vand.u32 4294901760, %v2860_v10  ;;  %v3086_v51 = vand.u32 4294901760, %v2846_v19  ;;  %v3087_v46 = vand.u32 4294901760, %v2871_v29  ;;  %v2191_v19 = vld [vmem:[%s2250_s20 + $0x8] sm:$0xff] }
 0x325   : > { %2080 = vmatpush1.bf16.msra.mxu1 %v2079_v53  ;;  %v2091_v53 = vpack.c.bf16 %v2815_v15, %v2826_v33 }
 0x326   : > { %2082 = vmatprep.subr.bf16.mxu1 %v2081_v49  ;;  %v2129_v25 = vpack.c.bf16 %v3086_v51, %v3085_v18  ;;  %v2131_v21 = vpack.c.bf16 %v3087_v46, %v1359_v1 }
 0x329   : > { %2084 = vmatpush1.bf16.msra.mxu1 %v2083_v62 }
 0x32a   : > { %1380 = vmatprep.subr.mxu1 %v1379_v57 }
 0x32d   : > { %1386 = vmatpush1.msra.mxu1 %v1385_v26 }
 0x32e   : > { %2086 = vmatprep.subr.bf16.mxu1 %v2085_v6  ;;  %1435 = vmatmul.mubr.f32.vlgmr.msra.gmra.mrb[0].mxu1 %v2741_v32 }
 0x32f   : > { %2088 = vmatpush1.bf16.msra.mxu1 %v2087_v28  ;;  %1541 = vmatprep.mubr.f32.mxu1 %v3059_v24 }
 0x330   : > { %2090 = vmatprep.subr.bf16.mxu1 %v2089_v58 }
 0x333   : > { %2092 = vmatpush1.bf16.msra.mxu1 %v2091_v53 }
 0x334   : > { %2094 = vmatprep.subr.bf16.mxu1 %v2093_v40 }
 0x337   : > { %2096 = vmatpush1.bf16.msra.mxu1 %v2095_v59 }
 0x338   : > { %2098 = vmatprep.subr.bf16.mxu1 %v2097_v30 }
 0x33b   : > { %2100 = vmatpush1.bf16.msra.mxu1 %v2099_v2 }
 0x33c   : > { %1491 = vmatprep.subr.mxu1 %v2896_v5 }
 0x33f   : > { %1494 = vmatpush1.msra.mxu1 %v2913_v44 }
 0x340   : > { %2102 = vmatprep.subr.bf16.mxu1 %v2737_v42  ;;  %1544 = vmatmul.mubr.f32.vlgmr.msra.gmra.mrb[0].mxu1 %v2756_v63  ;;  %v2125_v63 = vpack.c.bf16 %v3083_v8, %v1329_v31 }
 0x341   : > { %2104 = vmatpush1.bf16.msra.mxu1 %v2739_v13  ;;  %1632 = vmatprep.mubr.f32.mxu1 %v3059_v24 }
 0x342   : > { %2106 = vmatprep.subr.bf16.mxu1 %v2774_v22 }
 0x345   : > { %2108 = vmatpush1.bf16.msra.mxu1 %v2776_v54 }
 0x346   : > { %2110 = vmatprep.subr.bf16.mxu1 %v2794_v16 }
 0x349   : > { %2112 = vmatpush1.bf16.msra.mxu1 %v2796_v7 }
 0x34a   : > { %2114 = vmatprep.subr.bf16.mxu1 %v2848_v34 }
 0x34d   : > { %2116 = vmatpush1.bf16.msra.mxu1 %v2850_v20 }
 0x34e   : > { %1583 = vmatprep.subr.mxu1 %v2858_v61 }
 0x351   : > { %1585 = vmatpush1.msra.mxu1 %v2884_v0 }
 0x352   : > { %2118 = vmatprep.subr.bf16.mxu1 %v2117_v56  ;;  %1636 = vmatmul.mubr.f32.vlgmr.msra.gmra.mrb[0].mxu1 %v1270_v50  ;;  %v2127_v50 = vpack.c.bf16 %v3084_v4, %v1335_v3 }
 0x353   : > { %2120 = vmatpush1.bf16.msra.mxu1 %v2119_v12  ;;  %1760 = vmatprep.mubr.f32.mxu1 %v3059_v24 }
 0x354   : > { %2122 = vmatprep.subr.bf16.mxu1 %v2121_v23 }
 0x357   : > { %2124 = vmatpush1.bf16.msra.mxu1 %v2123_v27 }
 0x358   : > { %2126 = vmatprep.subr.bf16.mxu1 %v2125_v63 }
 0x35b   : > { %2128 = vmatpush1.bf16.msra.mxu1 %v2127_v50 }
 0x35c   : > { %2130 = vmatprep.subr.bf16.mxu1 %v2129_v25 }
 0x35f   : > { %2132 = vmatpush1.bf16.msra.mxu1 %v2131_v21 }
 0x360   : > { %1709 = vmatprep.subr.mxu1 %v1377_v36 }
 0x363   : > { %1713 = vmatpush1.msra.mxu1 %v1383_v38 }
 0x364   : > { %2134 = vmatprep.subr.bf16.mxu1 %v2737_v42  ;;  %1762 = vmatmul.mubr.f32.vlgmr.msra.gmra.mrb[0].mxu1 %v2741_v32 }
 0x365   : > { %2136 = vmatpush1.bf16.msra.mxu1 %v2739_v13  ;;  %1850 = vmatprep.mubr.f32.mxu1 %v3059_v24 }
 0x366   : > { %2138 = vmatprep.subr.bf16.mxu1 %v2774_v22 }
 0x369   : > { %2140 = vmatpush1.bf16.msra.mxu1 %v2776_v54 }
 0x36a   : > { %2142 = vmatprep.subr.bf16.mxu1 %v2794_v16 }
 0x36d   : > { %2144 = vmatpush1.bf16.msra.mxu1 %v2796_v7 }
 0x36e   : > { %2146 = vmatprep.subr.bf16.mxu1 %v2848_v34 }
 0x371   : > { %2148 = vmatpush1.bf16.msra.mxu1 %v2850_v20 }
 0x372   : > { %1801 = vmatprep.subr.mxu1 %v2858_v61 }
 0x375   : > { %1803 = vmatpush1.msra.mxu1 %v2884_v0 }
 0x376   : > { %1852 = vmatmul.mubr.f32.vlgmr.msra.gmra.mrb[0].mxu1 %v2741_v32 }
 0x449   : > { %v1853_v42 = vpop.f32.mrb[0].mxu1 }
 0x44a   : > { %v1855_v24 = vpop.f32.mrb[1].mxu1  ;;  %v1861_v13 = vmul.f32 %v1853_v42, %v1853_v42 }
 0x44b   : > { %v1862_v48 = vmul.f32 %v1855_v24, %v1855_v24  ;;  %v1858_v22 = vadd.f32 %v1855_v24, %v1853_v42 }
 0x44d   : > { %1859 = vadd.xlane.f32.xlu0 %v1858_v22  ;;  %v1863_v54 = vadd.f32 %v1862_v48, %v1861_v13 }
 0x44f   : > { %1864 = vadd.xlane.f32.xlu1 %v1863_v54 }
 0x4da   : > { %v1860_v31 = vpop.xlane.xlu0 %1859 }
 0x4db   : > { %v1866_v16 = vmul.f32 0.00390625, %v1860_v31 }
 0x4dc   : > { %v1865_v7 = vpop.xlane.xlu1 %1864 }
 0x4dd   : > { %v1867_v3 = vmul.f32 0.00390625, %v1865_v7  ;;  %v1868_v55 = vmul.f32 %v1866_v16, %v1866_v16  ;;  %v1871_v32 = vsub.f32 %v1853_v42, %v1866_v16  ;;  %v1872_v11 = vsub.f32 %v1855_v24, %v1866_v16 }
 0x4df   : > { %v1869_v9 = vsub.f32 %v1867_v3, %v1868_v55 }
 0x4e1   : > { %v1870_v47 = vmax.f32 %v1869_v9, 0.0 }
 0x4e3   : > { %v1873_v15 = vadd.f32 1e-05, %v1870_v47 }
 0x4e5   : > { %2188 = vrsqrt.f32 %v1873_v15 }
 0x4ef   : > { %v2189_v33 = vpop.eup %2188 }
 0x4f0   : > { %v1875_v60 = vmul.f32 %v2189_v33, %v1871_v32  ;;  %v1876_v45 = vmul.f32 %v2189_v33, %v1872_v11 }
 0x4f2   : > { %v1877_v43 = vadd.f32 %v2190_v39, %v1875_v60  ;;  %v1878_v34 = vadd.f32 %v2191_v19, %v1876_v45 }
 0x4f4   : > { %vm1879_vm11 = vcmp.ge.f32.partialorder %v1877_v43, 0.0  ;;  %vm1880_vm12 = vcmp.ge.f32.partialorder %v1878_v34, 0.0  ;;  %v1881_v20 = vmul.f32 0.2, %v1877_v43  ;;  %v1882_v1 = vmul.f32 0.2, %v1878_v34 }
 0x4f6   : > { %v1883_v35 = vsel %vm1879_vm11, %v1877_v43, %v1881_v20  ;;  %v1884_v61 = vsel %vm1880_vm12, %v1878_v34, %v1882_v1 }
 0x4f7   : > { %1885 = vst [vmem:[%s197_s21] sm:$0xff] %v1883_v35  ;;  %1886 = vst [vmem:[%s197_s21 + $0x8] sm:$0xff] %v1884_v61 }
 0x4f8 PF: > { %s14_s15 = sadd.s32 1, %s2198_s15  }
 0x4f9   : > { %p11_p4 = scmp.ge.s32.totalorder %s14_s15, 4  }
 0x4fb   :  { %13 = sbr.rel (!%p11_p4) target bundleno = 1 (0x1), region = 66 }

</bundles_post_ra>
